<compile_context>
chip_gen: v7x
topology: tpu7x:2x2x1
jax: 0.10.0
libtpu: 0.0.40
codegen_flags: <defaults>
</compile_context>

<pallas_src>
import jax
import jax.numpy as jnp
from jax.experimental import pallas as pl
from jax.experimental.pallas import tpu as pltpu


def _round_up(x: int, m: int) -> int:
    return ((x + m - 1) // m) * m


def _cdiv(a: int, b: int) -> int:
    return (a + b - 1) // b


def _avg_readout_kernel(mask_ref, emb_ref, out_ref, acc_ref, rsum_ref):
    k = pl.program_id(1)

    @pl.when(k == 0)
    def _init():
        acc_ref[...] = jnp.zeros_like(acc_ref)
        rsum_ref[...] = jnp.zeros_like(rsum_ref)

    mask = mask_ref[...]                                    # (tm, tk), native dtype
    # MXU: partial vsum accumulation in f32 (inputs fed in their native dtype).
    acc_ref[...] += jnp.dot(mask, emb_ref[...],
                            preferred_element_type=jnp.float32)
    # XLU cross-lane reduce (off the MXU critical path): partial row_sum.
    # Accumulate in f32 regardless of mask dtype (PyTorch fp32 opmath).
    rsum_ref[...] += jnp.sum(mask, axis=1, keepdims=True, dtype=jnp.float32)

    @pl.when(k == pl.num_programs(1) - 1)
    def _epilogue():
        vsum = acc_ref[...]                                 # (tm, Dp) f32
        # Exact reciprocal of a (tm, 1) vector: negligible work, and preserves
        # the module's zero-row semantics exactly (1/0 = inf, 0 * inf = NaN).
        global_emb = vsum * (jnp.float32(1.0) / rsum_ref[...])
        # F.normalize(p=2, dim=1, eps=1e-12): clamp on the norm == 1e-24 clamp on sq.
        sq = jnp.sum(global_emb * global_emb, axis=1, keepdims=True)
        inv_norm = jax.lax.rsqrt(jnp.maximum(sq, 1e-24))    # EUP rsqrt, no divide
        out_ref[...] = (global_emb * inv_norm).astype(out_ref.dtype)


def avg_readout(emb: jax.Array,
                mask: jax.Array,
                *,
                emb_tile_bytes: int = 2 << 20,       # ~2 MiB emb DMA per grid step
                resident_emb_bytes: int = 8 << 20,   # keep full emb resident if under
                compute_dtype=None) -> jax.Array:
    """Pallas implementation of AvgReadout.forward(emb, mask).

    emb:  (N, D) node embeddings
    mask: (M, N) per-row (graph/cluster) membership weights
    returns: (M, D) L2-normalized averaged embeddings
    """
    M, N = mask.shape
    N2, D = emb.shape
    assert N == N2, "mask.shape[1] must equal emb.shape[0]"
    out_dtype = jnp.result_type(mask.dtype, emb.dtype)
    if compute_dtype is not None:
        # Optional narrow-dtype feed (e.g. bf16): halves the dominant HBM stream;
        # all accumulation stays f32 inside the kernel.
        mask = mask.astype(compute_dtype)
        emb = emb.astype(compute_dtype)

    mask_isz = jnp.dtype(mask.dtype).itemsize
    emb_isz = jnp.dtype(emb.dtype).itemsize
    out_isz = jnp.dtype(out_dtype).itemsize

    Dp = _round_up(D, 128)
    Nr = _round_up(N, 128)

    # ---- Row tile (M): dtype-dependent sublane minimum, 256-row MXU target on
    # v6e/v7x, f32 accumulator capped at ~4 MiB of VMEM.
    sublane = max(8, 32 // mask_isz)
    tm_cap = 256
    while tm_cap > 128 and tm_cap * Dp * 4 > (4 << 20):
        tm_cap //= 2
    tm = min(_round_up(M, sublane), max(tm_cap, sublane))
    Mp = _round_up(M, tm)
    n_i = Mp // tm

    # ---- Contraction tile (N): keep the whole emb as one resident block when it
    # fits the budget (its block index is then constant across the whole grid, so
    # it is DMA'd exactly once); otherwise size the tile to ~emb_tile_bytes per
    # step and split Nr into equal 128-aligned chunks.
    emb_resident = Nr * Dp * emb_isz <= resident_emb_bytes
    if emb_resident:
        tk, kn = Nr, 1
    else:
        rows_per_tile = emb_tile_bytes // (Dp * emb_isz)
        tk_target = max(128, min(2048, (rows_per_tile // 128) * 128))
        if tk_target < 256 and 256 * Dp * emb_isz <= (8 << 20):
            tk_target = 256                      # amortize per-step overhead
        tk_target = min(tk_target, Nr)
        kn = _cdiv(Nr, tk_target)
        tk = _round_up(_cdiv(Nr, kn), 128)       # equal 128-aligned chunks
    Np = kn * tk

    # Zero padding is semantically inert (adds nothing to vsum or row_sum); padded
    # rows/cols are sliced off below.
    mask_p = mask if (Mp, Np) == (M, N) else jnp.pad(mask, ((0, Mp - M), (0, Np - N)))
    emb_p = emb if (Np, Dp) == (N, D) else jnp.pad(emb, ((0, Np - N), (0, Dp - D)))

    # Explicit scoped-VMEM budget sized to the tiles, with headroom for Mosaic
    # scratch (v5e default is 16 MiB, v6e 32 MiB, v7x 32 of 64 MiB physical).
    vmem_est = (2 * tm * tk * mask_isz          # mask, double-buffered
                + 2 * tk * Dp * emb_isz         # emb, double-buffered
                + 2 * tm * Dp * out_isz         # out, double-buffered
                + tm * Dp * 4                   # vsum accumulator
                + tm * 128 * 4)                 # row_sum accumulator (lane-padded)
    vmem_limit = int(min(max(2 * vmem_est + (1 << 20), 32 << 20), 64 << 20))

    out = pl.pallas_call(
        _avg_readout_kernel,
        out_shape=jax.ShapeDtypeStruct((Mp, Dp), out_dtype),
        grid_spec=pltpu.PrefetchScalarGridSpec(
            num_scalar_prefetch=0,
            grid=(n_i, kn),
            in_specs=[
                pl.BlockSpec((tm, tk), lambda i, k: (i, k)),   # mask tile
                # emb index is independent of i; with kn == 1 the block index
                # never changes, so emb is fetched once and stays VMEM-resident
                # across every row tile (no re-streaming).
                pl.BlockSpec((tk, Dp), lambda i, k: (k, 0)),   # emb tile
            ],
            out_specs=pl.BlockSpec((tm, Dp), lambda i, k: (i, 0)),
            scratch_shapes=[
                pltpu.VMEM((tm, Dp), jnp.float32),             # vsum accumulator
                pltpu.VMEM((tm, 1), jnp.float32),              # row_sum accumulator
            ],
        ),
        compiler_params=pltpu.CompilerParams(
            dimension_semantics=("parallel", "arbitrary"),
            vmem_limit_bytes=vmem_limit,
        ),
        cost_estimate=pl.CostEstimate(
            flops=2 * Mp * Np * Dp,
            transcendentals=2 * Mp,
            bytes_accessed=(mask_p.size * mask_isz
                            + (1 if emb_resident else n_i) * emb_p.size * emb_isz
                            + Mp * Dp * out_isz),
        ),
    )(mask_p, emb_p)

    if (Mp, Dp) != (M, D):
        out = out[:M, :D]
    return out


def _reference(emb, mask):
    vsum = mask @ emb
    row_sum = jnp.sum(mask, axis=1, keepdims=True)
    global_emb = vsum / row_sum
    norm = jnp.maximum(jnp.linalg.norm(global_emb, axis=1, keepdims=True), 1e-12)
    return global_emb / norm


if __name__ == "__main__":
    key = jax.random.PRNGKey(0)
    k1, k2, k3, k4, k5, k6 = jax.random.split(key, 6)

    # Case 1: tile-friendly shapes — resident-emb path (single k block, grid (1,1)),
    # lane-dense D=128 output.
    M, N, D = 16, 1024, 128
    mask = jax.random.uniform(k1, (M, N), dtype=jnp.float32, minval=0.1, maxval=1.0)
    emb = jax.random.normal(k2, (N, D), dtype=jnp.float32)
    out = jax.block_until_ready(avg_readout(emb, mask))
    ref = _reference(emb, mask)
    assert out.shape == (M, D)
    assert jnp.allclose(out, ref, atol=1e-4, rtol=1e-4), "mismatch vs reference (case 1)"

    # Case 2: ragged shapes — exercises the pad-to-(8,128)-and-slice path.
    M2, N2, D2 = 7, 100, 48
    mask2 = jax.random.uniform(k3, (M2, N2), dtype=jnp.float32, minval=0.1, maxval=1.0)
    emb2 = jax.random.normal(k4, (N2, D2), dtype=jnp.float32)
    out2 = jax.block_until_ready(avg_readout(emb2, mask2))
    ref2 = _reference(emb2, mask2)
    assert out2.shape == (M2, D2)
    assert jnp.allclose(out2, ref2, atol=1e-4, rtol=1e-4), "mismatch vs reference (case 2)"

    # Case 3: multi-row-tile AND multi-k-tile path (forced via tiny tile budgets):
    # grid (2, 2) with padding on both M and N — exercises the k-accumulation
    # pipeline and the init/epilogue gating across row tiles.
    M3, N3, D3 = 300, 640, 128
    mask3 = jax.random.uniform(k5, (M3, N3), dtype=jnp.float32, minval=0.1, maxval=1.0)
    emb3 = jax.random.normal(k6, (N3, D3), dtype=jnp.float32)
    out3 = jax.block_until_ready(
        avg_readout(emb3, mask3, resident_emb_bytes=0, emb_tile_bytes=1 << 18))
    ref3 = _reference(emb3, mask3)
    assert out3.shape == (M3, D3)
    assert jnp.allclose(out3, ref3, atol=1e-4, rtol=1e-4), "mismatch vs reference (case 3)"

    # Case 4: optional bf16 feed (halves the HBM stream); f32 accumulation inside.
    out4 = jax.block_until_ready(
        avg_readout(emb, mask, compute_dtype=jnp.bfloat16))
    assert out4.shape == (M, D)
    assert jnp.allclose(out4, ref, atol=2e-2, rtol=2e-2), "mismatch vs reference (case 4)"

    print("KERNEL_OK")
</pallas_src>

<mosaic_0001>
module attributes {stable_mosaic.version = 11 : i64} {
  func.func @_avg_readout_kernel(%arg0: i32, %arg1: i32, %arg2: memref<16x1024xf32, #tpu.memory_space<vmem>>, %arg3: memref<1024x128xf32, #tpu.memory_space<vmem>>, %arg4: memref<16x128xf32, #tpu.memory_space<vmem>>, %arg5: memref<16x128xf32, #tpu.memory_space<vmem>>, %arg6: memref<16x1xf32, #tpu.memory_space<vmem>>) attributes {dimension_semantics = [#tpu.dimension_semantics<parallel>, #tpu.dimension_semantics<arbitrary>], iteration_bounds = array<i64: 1, 1>, scalar_prefetch = 0 : i64, scratch_operands = 2 : i64, tpu.core_type = #tpu.core_type<tc>, window_params = [{transform_indices = @transform_0, window_bounds = array<i64: 16, 1024>}, {transform_indices = @transform_1, window_bounds = array<i64: 1024, 128>}, {transform_indices = @transform_2, window_bounds = array<i64: 16, 128>}]} {
    %c0_i32 = arith.constant 0 : i32
    %0 = arith.cmpi eq, %arg1, %c0_i32 : i32
    %1 = arith.extui %0 : i1 to i32
    %c0_i32_0 = arith.constant 0 : i32
    %2 = arith.cmpi ne, %1, %c0_i32_0 : i32
    scf.if %2 {
      %cst_15 = arith.constant 0.000000e+00 : f32
      %17 = vector.broadcast %cst_15 : f32 to vector<16x128xf32>
      %c0_16 = arith.constant 0 : index
      %c0_17 = arith.constant 0 : index
      %18 = vector.load %arg5[%c0_16, %c0_17] : memref<16x128xf32, #tpu.memory_space<vmem>>, vector<16x128xf32>
      tpu.vector_store %arg5[%c0_16, %c0_17], %17 {strides = array<i32>} : memref<16x128xf32, #tpu.memory_space<vmem>>, vector<16x128xf32>,
      %cst_18 = arith.constant 0.000000e+00 : f32
      %19 = vector.broadcast %cst_18 : f32 to vector<16x1xf32>
      %c0_19 = arith.constant 0 : index
      %c0_20 = arith.constant 0 : index
      %20 = vector.load %arg6[%c0_19, %c0_20] : memref<16x1xf32, #tpu.memory_space<vmem>>, vector<16x1xf32>
      tpu.vector_store %arg6[%c0_19, %c0_20], %19 {strides = array<i32>} : memref<16x1xf32, #tpu.memory_space<vmem>>, vector<16x1xf32>,
    } else {
    }
    %c0 = arith.constant 0 : index
    %c0_1 = arith.constant 0 : index
    %3 = vector.load %arg2[%c0, %c0_1] : memref<16x1024xf32, #tpu.memory_space<vmem>>, vector<16x1024xf32>
    %c0_2 = arith.constant 0 : index
    %c0_3 = arith.constant 0 : index
    %4 = vector.load %arg5[%c0_2, %c0_3] : memref<16x128xf32, #tpu.memory_space<vmem>>, vector<16x128xf32>
    %c0_4 = arith.constant 0 : index
    %c0_5 = arith.constant 0 : index
    %5 = vector.load %arg3[%c0_4, %c0_5] : memref<1024x128xf32, #tpu.memory_space<vmem>>, vector<1024x128xf32>
    %cst = arith.constant dense<0.000000e+00> : vector<16x128xf32>
    %6 = tpu.matmul %3, %5, %cst {dimension_numbers = #tpu.dot_dimension_numbers<[1], [0], [0], [1], [0, 0, 1, 1], [], []>} : vector<16x1024xf32>, vector<1024x128xf32>, vector<16x128xf32> -> vector<16x128xf32>
    %7 = arith.addf %4, %6 : vector<16x128xf32>
    %c0_6 = arith.constant 0 : index
    %c0_7 = arith.constant 0 : index
    %8 = vector.load %arg5[%c0_6, %c0_7] : memref<16x128xf32, #tpu.memory_space<vmem>>, vector<16x128xf32>
    tpu.vector_store %arg5[%c0_6, %c0_7], %7 {strides = array<i32>} : memref<16x128xf32, #tpu.memory_space<vmem>>, vector<16x128xf32>,
    %c0_8 = arith.constant 0 : index
    %c0_9 = arith.constant 0 : index
    %9 = vector.load %arg6[%c0_8, %c0_9] : memref<16x1xf32, #tpu.memory_space<vmem>>, vector<16x1xf32>
    %cst_10 = arith.constant dense<0.000000e+00> : vector<16xf32>
    %10 = vector.multi_reduction <add>, %3, %cst_10 [1] : vector<16x1024xf32> to vector<16xf32>
    %11 = vector.shape_cast %10 : vector<16xf32> to vector<16x1xf32>
    %12 = arith.addf %9, %11 : vector<16x1xf32>
    %c0_11 = arith.constant 0 : index
    %c0_12 = arith.constant 0 : index
    %13 = vector.load %arg6[%c0_11, %c0_12] : memref<16x1xf32, #tpu.memory_space<vmem>>, vector<16x1xf32>
    tpu.vector_store %arg6[%c0_11, %c0_12], %12 {strides = array<i32>} : memref<16x1xf32, #tpu.memory_space<vmem>>, vector<16x1xf32>,
    %c0_i32_13 = arith.constant 0 : i32
    %14 = arith.cmpi eq, %arg1, %c0_i32_13 : i32
    %15 = arith.extui %14 : i1 to i32
    %c0_i32_14 = arith.constant 0 : i32
    %16 = arith.cmpi ne, %15, %c0_i32_14 : i32
    scf.if %16 {
      %c0_15 = arith.constant 0 : index
      %c0_16 = arith.constant 0 : index
      %17 = vector.load %arg5[%c0_15, %c0_16] : memref<16x128xf32, #tpu.memory_space<vmem>>, vector<16x128xf32>
      %c0_17 = arith.constant 0 : index
      %c0_18 = arith.constant 0 : index
      %18 = vector.load %arg6[%c0_17, %c0_18] : memref<16x1xf32, #tpu.memory_space<vmem>>, vector<16x1xf32>
      %cst_19 = arith.constant 1.000000e+00 : f32
      %19 = vector.broadcast %cst_19 : f32 to vector<16x1xf32>
      %20 = arith.divf %19, %18 : vector<16x1xf32>
      %21 = vector.broadcast %20 : vector<16x1xf32> to vector<16x128xf32>
      %22 = arith.mulf %17, %21 : vector<16x128xf32>
      %23 = arith.mulf %22, %22 : vector<16x128xf32>
      %cst_20 = arith.constant dense<0.000000e+00> : vector<16xf32>
      %24 = vector.multi_reduction <add>, %23, %cst_20 [1] : vector<16x128xf32> to vector<16xf32>
      %25 = vector.shape_cast %24 : vector<16xf32> to vector<16x1xf32>
      %cst_21 = arith.constant 1.000000e-24 : f32
      %26 = vector.broadcast %cst_21 : f32 to vector<16x1xf32>
      %27 = arith.maximumf %25, %26 : vector<16x1xf32>
      %28 = math.rsqrt %27 : vector<16x1xf32>
      %29 = vector.broadcast %28 : vector<16x1xf32> to vector<16x128xf32>
      %30 = arith.mulf %22, %29 : vector<16x128xf32>
      %c0_22 = arith.constant 0 : index
      %c0_23 = arith.constant 0 : index
      %31 = vector.load %arg4[%c0_22, %c0_23] : memref<16x128xf32, #tpu.memory_space<vmem>>, vector<16x128xf32>
      tpu.vector_store %arg4[%c0_22, %c0_23], %30 {strides = array<i32>} : memref<16x128xf32, #tpu.memory_space<vmem>>, vector<16x128xf32>,
    } else {
    }
    return
  }
  func.func @transform_0(%arg0: i32, %arg1: i32) -> (i32, i32) {
    %c0_i32 = arith.constant 0 : i32
    return %arg0, %arg1 : i32, i32
  }
  func.func @transform_1(%arg0: i32, %arg1: i32) -> (i32, i32) {
    %c0_i32 = arith.constant 0 : i32
    %c0_i32_0 = arith.constant 0 : i32
    return %arg1, %c0_i32 : i32, i32
  }
  func.func @transform_2(%arg0: i32, %arg1: i32) -> (i32, i32) {
    %c0_i32 = arith.constant 0 : i32
    %c0_i32_0 = arith.constant 0 : i32
    return %arg0, %c0_i32 : i32, i32
  }
}

</mosaic_0001>

<bundles_post_ra>
// kernel: tpu_custom_call.1
= control target key start
LH: loop header
LB: loop body
LE: loop exit
PB: predicated region body
PF: predicated region fallthrough
CT: control target
= control target key end

     0   :  { %7 = vsyncpa [#allocation5], 0  ;;  %s1076_s0 = inlined_call_operand.hbm [shape: f32[16,1024], index: 0, kind: input, shape index: {}]   ;;  %s1077_s1 = inlined_call_operand.hbm [shape: f32[1024,128], index: 1, kind: input, shape index: {}]   ;;  %s1078_s2 = inlined_call_operand.hbm [shape: f32[16,128], index: 2, kind: output, shape index: {}]  }
   0x1   :  { %8 = vsyncpa [#allocation8], 0 }
   0x2   :  { %9 = vsyncpa [#allocation6], 0  ;;  %s950_s9 = smov [#allocation4]   ;;  %s878_s13 = scalar_lea.hbm %s1076_s0, 2048 }
   0x3   :  { %s15_s10 = sshll.u32 %s950_s9, 4  ;;  %p879_p0 = scmp.ne.s32.totalorder %s1076_s0, %s878_s13  ;;  %s16_s10 = int_to_ptr.vmem [resolvable:$true] %s15_s10 }
   0x4   :  { %p882_p1 = scmp.lt.u32.totalorder %s878_s13, %s1076_s0 }
   0x6   :  { %p884_p2 = pnand %p882_p1, %p879_p0 }
   0x8   :  { %887 = shalt.err (!%p884_p2)
}
   0x9   :  { %s888_s18 = scalar_lea.vmem %s16_s10, 2048  ;;  %p893_p4 = scmp.lt.s32.totalorder %s16_s10, %s16_s10 }
   0xa   :  { %p889_p3 = scmp.ne.s32.totalorder %s16_s10, %s888_s18  ;;  %p894_p5 = scmp.lt.s32.totalorder %s888_s18, %s888_s18 }
   0xc   :  { %p895_p6 = por %p894_p5, %p893_p4 }
   0xe   :  { %p896_p7 = pnand %p895_p6, %p889_p3 }
  0x10   :  { %899 = shalt.err (!%p896_p7)
}
  0x11   :  { %s951_s19 = smov 1024   ;;  %s952_s20 = smov 64  }
  0x12   :  { %21 = dma.hbm_to_vmem [thread:$0]  %s1076_s0, 2048, %s16_s10, [#allocation5], %s951_s19, %s951_s19, %s952_s20  }
  0x13   :  { %s953_s23 = smov [#allocation7]   ;;  %s900_s27 = scalar_lea.hbm %s1077_s1, 16384 }
  0x14   :  { %s27_s24 = sshll.u32 %s953_s23, 4  ;;  %p901_p8 = scmp.ne.s32.totalorder %s1077_s1, %s900_s27  ;;  %s28_s24 = int_to_ptr.vmem [resolvable:$true] %s27_s24 }
  0x15   :  { %p904_p9 = scmp.lt.u32.totalorder %s900_s27, %s1077_s1 }
  0x17   :  { %p906_p10 = pnand %p904_p9, %p901_p8 }
  0x19   :  { %909 = shalt.err (!%p906_p10)
}
  0x1a   :  { %s910_s4 = scalar_lea.vmem %s28_s24, 16384  ;;  %p915_p12 = scmp.lt.s32.totalorder %s28_s24, %s28_s24 }
  0x1b   :  { %p911_p11 = scmp.ne.s32.totalorder %s28_s24, %s910_s4  ;;  %p916_p13 = scmp.lt.s32.totalorder %s910_s4, %s910_s4 }
  0x1d   :  { %p917_p0 = por %p916_p13, %p915_p12 }
  0x1f   :  { %p918_p1 = pnand %p917_p0, %p911_p11 }
  0x21   :  { %921 = shalt.err (!%p918_p1)
}
  0x22   :  { %s954_s0 = smov 128   ;;  %s955_s5 = smov 8  }
  0x23   :  { %33 = dma.hbm_to_vmem [thread:$0]  %s1077_s1, 16384, %s28_s24, [#allocation8], %s954_s0, %s954_s0, %s955_s5  }
  0x24   :  { %944 = dma.done.wait [#allocation5], 2048  }
  0x25   :  { %945 = vsyncadd [#allocation5], 4294965248 }
  0x26   :  { %946 = dma.done.wait [#allocation8], 16384  }
  0x27   :  { %947 = vsyncadd [#allocation8], 4294950912  ;;  %vm46_vm0 = vcmask 7168   ;;  %v956_v0 = vmov 0.0   ;;  %v83_v1 = vld [vmem:[#allocation7 + $0x80] sm:$0xff]  ;;  %v84_v2 = vld [vmem:[#allocation7 + $0x88] sm:$0xff] }
  0x28   :  { %47 = vst.msk [vmem:[#allocation3] sm:$0xff] %vm46_vm0, %v956_v0  ;;  %48 = vst.msk [vmem:[#allocation3 + $0x8] sm:$0xff] %vm46_vm0, %v956_v0  ;;  %v67_v3 = vld [vmem:[#allocation7] sm:$0xff]  ;;  %v731_v4 = vpack.c.bf16 %v84_v2, %v83_v1  ;;  %v68_v5 = vld [vmem:[#allocation7 + $0x8] sm:$0xff]  ;;  %s958_s1 = smov [#allocation9]  }
  0x29   :  { %v115_v6 = vld [vmem:[#allocation7 + $0x180] sm:$0xff]  ;;  %v116_v7 = vld [vmem:[#allocation7 + $0x188] sm:$0xff]  ;;  %v733_v8 = vpack.c.bf16 %v68_v5, %v67_v3  ;;  %v85_v12 = vld [vmem:[#allocation7 + $0x90] sm:$0xff]  ;;  %s566_s8 = sshll.u32 %s958_s1, 4  ;;  %s567_s8 = int_to_ptr.vmem [resolvable:$true] %s566_s8 }
  0x2a   :  { %v763_v9 = vpack.c.bf16 %v116_v7, %v115_v6  ;;  %v99_v10 = vld [vmem:[#allocation7 + $0x100] sm:$0xff]  ;;  %v100_v11 = vld [vmem:[#allocation7 + $0x108] sm:$0xff]  ;;  %732 = vmatprep.subr.bf16.mxu0 %v731_v4  ;;  %v86_v14 = vld [vmem:[#allocation7 + $0x98] sm:$0xff]  ;;  %s922_s9 = scalar_lea.vmem %s567_s8, 256  ;;  %p927_p3 = scmp.lt.s32.totalorder %s567_s8, %s567_s8 }
  0x2b   :  { %v765_v13 = vpack.c.bf16 %v100_v11, %v99_v10  ;;  %v69_v15 = vld [vmem:[#allocation7 + $0x10] sm:$0xff]  ;;  %v70_v16 = vld [vmem:[#allocation7 + $0x18] sm:$0xff]  ;;  %734 = vmatpush3.bf16.msra.mxu0 %v733_v8  ;;  %v735_v17 = vpack.c.bf16 %v86_v14, %v85_v12  ;;  %v87_v24 = vld [vmem:[#allocation7 + $0xa0] sm:$0xff]  ;;  %p923_p2 = scmp.ne.s32.totalorder %s567_s8, %s922_s9  ;;  %p928_p4 = scmp.lt.s32.totalorder %s922_s9, %s922_s9 }
  0x2c   :  { %764 = vmatprep.subr.bf16.mxu1 %v763_v9  ;;  %v737_v18 = vpack.c.bf16 %v70_v16, %v69_v15  ;;  %v117_v19 = vld [vmem:[#allocation7 + $0x190] sm:$0xff]  ;;  %v118_v20 = vld [vmem:[#allocation7 + $0x198] sm:$0xff]  ;;  %v88_v25 = vld [vmem:[#allocation7 + $0xa8] sm:$0xff] }
  0x2d   :  { %v101_v21 = vld [vmem:[#allocation7 + $0x110] sm:$0xff]  ;;  %766 = vmatpush3.bf16.msra.mxu1 %v765_v13  ;;  %v767_v22 = vpack.c.bf16 %v118_v20, %v117_v19  ;;  %v102_v23 = vld [vmem:[#allocation7 + $0x118] sm:$0xff]  ;;  %736 = vmatprep.subr.bf16.mxu0 %v735_v17  ;;  %v739_v27 = vpack.c.bf16 %v88_v25, %v87_v24  ;;  %v71_v28 = vld [vmem:[#allocation7 + $0x20] sm:$0xff]  ;;  %p929_p5 = por %p928_p4, %p927_p3 }
  0x2e   :  { %v769_v26 = vpack.c.bf16 %v102_v23, %v101_v21  ;;  %v72_v29 = vld [vmem:[#allocation7 + $0x28] sm:$0xff]  ;;  %v119_v30 = vld [vmem:[#allocation7 + $0x1a0] sm:$0xff]  ;;  %v89_v36 = vld [vmem:[#allocation7 + $0xb0] sm:$0xff] }
  0x2f   :  { %768 = vmatprep.subr.bf16.mxu1 %v767_v22  ;;  %v120_v31 = vld [vmem:[#allocation7 + $0x1a8] sm:$0xff]  ;;  %v103_v32 = vld [vmem:[#allocation7 + $0x120] sm:$0xff]  ;;  %738 = vmatpush3.bf16.msra.mxu0 %v737_v18  ;;  %v741_v34 = vpack.c.bf16 %v72_v29, %v71_v28  ;;  %v90_v37 = vld [vmem:[#allocation7 + $0xb8] sm:$0xff]  ;;  %p930_p6 = pnand %p929_p5, %p923_p2 }
  0x30   :  { %v104_v33 = vld [vmem:[#allocation7 + $0x128] sm:$0xff]  ;;  %v771_v35 = vpack.c.bf16 %v120_v31, %v119_v30  ;;  %v1003_v38 = vld [vmem:[#allocation4] sm:$0xff]  ;;  %740 = vmatprep.subr.bf16.mxu0 %v739_v27  ;;  %v743_v40 = vpack.c.bf16 %v90_v37, %v89_v36  ;;  %v1005_v42 = vld [vmem:[#allocation4 + $0x10] sm:$0xff] }
  0x31   :  { %770 = vmatpush3.bf16.msra.mxu1 %v769_v26  ;;  %v773_v39 = vpack.c.bf16 %v104_v33, %v103_v32  ;;  %v50_v41 = vld [vmem:[#allocation4 + $0x8] sm:$0xff]  ;;  %v52_v43 = vld [vmem:[#allocation4 + $0x18] sm:$0xff]  ;;  %v1008_v45 = vld [vmem:[#allocation4 + $0x20] sm:$0xff] }
  0x32   :  { %772 = vmatprep.subr.bf16.mxu1 %v771_v35  ;;  %v501_v44 = vadd.f32 %v50_v41, %v1003_v38  ;;  %259 = vmatprep.mubr.f32.mxu0 %v50_v41  ;;  %v73_v46 = vld [vmem:[#allocation7 + $0x30] sm:$0xff]  ;;  %v74_v47 = vld [vmem:[#allocation7 + $0x38] sm:$0xff]  ;;  %v91_v55 = vld [vmem:[#allocation7 + $0xc0] sm:$0xff] }
  0x33   :  { %334 = vmatprep.mubr.f32.mxu1 %v52_v43  ;;  %742 = vmatpush3.bf16.msra.mxu0 %v741_v34  ;;  %v745_v49 = vpack.c.bf16 %v74_v47, %v73_v46  ;;  %v121_v50 = vld [vmem:[#allocation7 + $0x1b0] sm:$0xff]  ;;  %v122_v51 = vld [vmem:[#allocation7 + $0x1b8] sm:$0xff]  ;;  %v92_v56 = vld [vmem:[#allocation7 + $0xc8] sm:$0xff] }
  0x34   :  { %v502_v48 = vadd.f32 %v501_v44, %v1005_v42  ;;  %v105_v52 = vld [vmem:[#allocation7 + $0x130] sm:$0xff]  ;;  %744 = vmatprep.subr.bf16.mxu0 %v743_v40  ;;  %v775_v53 = vpack.c.bf16 %v122_v51, %v121_v50  ;;  %v106_v54 = vld [vmem:[#allocation7 + $0x138] sm:$0xff]  ;;  %v747_v59 = vpack.c.bf16 %v92_v56, %v91_v55  ;;  %v1011_v60 = vld [vmem:[#allocation4 + $0x40] sm:$0xff] }
  0x35   :  { %774 = vmatpush3.bf16.msra.mxu1 %v773_v39  ;;  %v777_v58 = vpack.c.bf16 %v106_v54, %v105_v52  ;;  %v1013_v61 = vld [vmem:[#allocation4 + $0x48] sm:$0xff]  ;;  %v1015_v62 = vld [vmem:[#allocation4 + $0x50] sm:$0xff]  ;;  %v1024_v3 = vld [vmem:[#allocation4 + $0x58] sm:$0xff] }
  0x36   :  { %v503_v57 = vadd.f32 %v502_v48, %v52_v43  ;;  %v1017_v63 = vld [vmem:[#allocation4 + $0x28] sm:$0xff]  ;;  %v1019_v0 = vld [vmem:[#allocation4 + $0x30] sm:$0xff]  ;;  %776 = vmatprep.subr.bf16.mxu1 %v775_v53  ;;  %v510_v1 = vadd.f32 %v1013_v61, %v1011_v60  ;;  %v1026_v4 = vld [vmem:[#allocation4 + $0x60] sm:$0xff] }
  0x37   :  { %746 = vmatpush3.bf16.msra.mxu0 %v745_v49  ;;  %v75_v5 = vld [vmem:[#allocation7 + $0x40] sm:$0xff]  ;;  %v1028_v6 = vld [vmem:[#allocation4 + $0x38] sm:$0xff]  ;;  %v76_v8 = vld [vmem:[#allocation7 + $0x48] sm:$0xff] }
  0x38   :  { %v504_v2 = vadd.f32 %v503_v57, %v1008_v45  ;;  %748 = vmatprep.subr.bf16.mxu0 %v747_v59  ;;  %v511_v7 = vadd.f32 %v510_v1, %v1015_v62  ;;  %v123_v9 = vld [vmem:[#allocation7 + $0x1c0] sm:$0xff]  ;;  %v124_v10 = vld [vmem:[#allocation7 + $0x1c8] sm:$0xff]  ;;  %v749_v13 = vpack.c.bf16 %v76_v8, %v75_v5  ;;  %v93_v17 = vld [vmem:[#allocation7 + $0xd0] sm:$0xff] }
  0x39   :  { %778 = vmatpush3.bf16.msra.mxu1 %v777_v58  ;;  %v1032_v12 = vld [vmem:[#allocation4 + $0x68] sm:$0xff]  ;;  %v779_v14 = vpack.c.bf16 %v124_v10, %v123_v9  ;;  %v107_v15 = vld [vmem:[#allocation7 + $0x140] sm:$0xff]  ;;  %v94_v20 = vld [vmem:[#allocation7 + $0xd8] sm:$0xff] }
  0x3a   :  { %v505_v11 = vadd.f32 %v504_v2, %v1017_v63  ;;  %v108_v16 = vld [vmem:[#allocation7 + $0x148] sm:$0xff]  ;;  %v512_v18 = vadd.f32 %v511_v7, %v1024_v3  ;;  %v77_v21 = vld [vmem:[#allocation7 + $0x50] sm:$0xff]  ;;  %v78_v22 = vld [vmem:[#allocation7 + $0x58] sm:$0xff]  ;;  %v751_v25 = vpack.c.bf16 %v94_v20, %v93_v17 }
  0x3b   :  { %v781_v19 = vpack.c.bf16 %v108_v16, %v107_v15  ;;  %v1036_v24 = vld [vmem:[#allocation4 + $0x70] sm:$0xff]  ;;  %750 = vmatpush3.bf16.msra.mxu0 %v749_v13  ;;  %780 = vmatprep.subr.bf16.mxu1 %v779_v14  ;;  %v753_v26 = vpack.c.bf16 %v78_v22, %v77_v21  ;;  %v126_v28 = vld [vmem:[#allocation7 + $0x1d8] sm:$0xff]  ;;  %v95_v33 = vld [vmem:[#allocation7 + $0xe0] sm:$0xff] }
  0x3c   :  { %v506_v23 = vadd.f32 %v505_v11, %v1019_v0  ;;  %v125_v27 = vld [vmem:[#allocation7 + $0x1d0] sm:$0xff]  ;;  %v513_v30 = vadd.f32 %v512_v18, %v1026_v4  ;;  %v110_v32 = vld [vmem:[#allocation7 + $0x158] sm:$0xff]  ;;  %v96_v34 = vld [vmem:[#allocation7 + $0xe8] sm:$0xff]  ;;  %752 = vmatprep.subr.bf16.mxu0 %v751_v25 }
  0x3d   :  { %v109_v29 = vld [vmem:[#allocation7 + $0x150] sm:$0xff]  ;;  %782 = vmatpush3.bf16.msra.mxu1 %v781_v19  ;;  %v783_v31 = vpack.c.bf16 %v126_v28, %v125_v27  ;;  %v1040_v36 = vld [vmem:[#allocation4 + $0x78] sm:$0xff]  ;;  %v755_v39 = vpack.c.bf16 %v96_v34, %v95_v33  ;;  %v79_v40 = vld [vmem:[#allocation7 + $0x60] sm:$0xff] }
  0x3e   :  { %v507_v35 = vadd.f32 %v506_v23, %v1028_v6  ;;  %v785_v37 = vpack.c.bf16 %v110_v32, %v109_v29  ;;  %v80_v41 = vld [vmem:[#allocation7 + $0x68] sm:$0xff]  ;;  %v127_v43 = vld [vmem:[#allocation7 + $0x1e0] sm:$0xff]  ;;  %v514_v44 = vadd.f32 %v513_v30, %v1032_v12  ;;  %v97_v51 = vld [vmem:[#allocation7 + $0xf0] sm:$0xff] }
  0x3f   :  { %784 = vmatprep.subr.bf16.mxu1 %v783_v31  ;;  %v128_v46 = vld [vmem:[#allocation7 + $0x1e8] sm:$0xff]  ;;  %v111_v47 = vld [vmem:[#allocation7 + $0x160] sm:$0xff]  ;;  %754 = vmatpush3.bf16.msra.mxu0 %v753_v26  ;;  %v757_v49 = vpack.c.bf16 %v80_v41, %v79_v40  ;;  %v98_v52 = vld [vmem:[#allocation7 + $0xf8] sm:$0xff] }
  0x40   :  { %v112_v48 = vld [vmem:[#allocation7 + $0x168] sm:$0xff]  ;;  %508 = vadd.xlane.f32.xlu0 %v507_v35  ;;  %v787_v50 = vpack.c.bf16 %v128_v46, %v127_v43  ;;  %v81_v53 = vld [vmem:[#allocation7 + $0x70] sm:$0xff]  ;;  %v515_v54 = vadd.f32 %v514_v44, %v1036_v24  ;;  %756 = vmatprep.subr.bf16.mxu0 %v755_v39  ;;  %v82_v56 = vld [vmem:[#allocation7 + $0x78] sm:$0xff]  ;;  %v759_v59 = vpack.c.bf16 %v98_v52, %v97_v51 }
  0x41   :  { %786 = vmatpush3.bf16.msra.mxu1 %v785_v37  ;;  %v789_v55 = vpack.c.bf16 %v112_v48, %v111_v47  ;;  %v129_v57 = vld [vmem:[#allocation7 + $0x1f0] sm:$0xff]  ;;  %v130_v58 = vld [vmem:[#allocation7 + $0x1f8] sm:$0xff]  ;;  %v147_v7 = vld [vmem:[#allocation7 + $0x280] sm:$0xff]  ;;  %v761_v10 = vpack.c.bf16 %v82_v56, %v81_v53 }
  0x42   :  { %788 = vmatprep.subr.bf16.mxu1 %v787_v50  ;;  %v791_v1 = vpack.c.bf16 %v130_v58, %v129_v57  ;;  %v113_v2 = vld [vmem:[#allocation7 + $0x170] sm:$0xff]  ;;  %v114_v5 = vld [vmem:[#allocation7 + $0x178] sm:$0xff]  ;;  %v516_v8 = vadd.f32 %v515_v54, %v1040_v36  ;;  %v148_v9 = vld [vmem:[#allocation7 + $0x288] sm:$0xff] }
  0x43   :  { %758 = vmatpush3.bf16.msra.mxu0 %v757_v49  ;;  %v179_v11 = vld [vmem:[#allocation7 + $0x380] sm:$0xff]  ;;  %v180_v13 = vld [vmem:[#allocation7 + $0x388] sm:$0xff]  ;;  %v793_v14 = vpack.c.bf16 %v114_v5, %v113_v2  ;;  %v795_v15 = vpack.c.bf16 %v148_v9, %v147_v7  ;;  %v149_v21 = vld [vmem:[#allocation7 + $0x290] sm:$0xff] }
  0x44   :  { %517 = vadd.xlane.f32.xlu0 %v516_v8  ;;  %v131_v16 = vld [vmem:[#allocation7 + $0x200] sm:$0xff]  ;;  %v132_v17 = vld [vmem:[#allocation7 + $0x208] sm:$0xff]  ;;  %760 = vmatprep.subr.bf16.mxu0 %v759_v59  ;;  %v827_v19 = vpack.c.bf16 %v180_v13, %v179_v11  ;;  %v150_v22 = vld [vmem:[#allocation7 + $0x298] sm:$0xff] }
  0x45   :  { %790 = vmatpush3.bf16.msra.mxu1 %v789_v55  ;;  %v163_v18 = vld [vmem:[#allocation7 + $0x300] sm:$0xff]  ;;  %v164_v20 = vld [vmem:[#allocation7 + $0x308] sm:$0xff]  ;;  %v181_v23 = vld [vmem:[#allocation7 + $0x390] sm:$0xff]  ;;  %v797_v26 = vpack.c.bf16 %v132_v17, %v131_v16  ;;  %v799_v28 = vpack.c.bf16 %v150_v22, %v149_v21 }
  0x46   :  { %792 = vmatprep.subr.bf16.mxu1 %v791_v1  ;;  %v182_v25 = vld [vmem:[#allocation7 + $0x398] sm:$0xff]  ;;  %v829_v27 = vpack.c.bf16 %v164_v20, %v163_v18  ;;  %v133_v29 = vld [vmem:[#allocation7 + $0x210] sm:$0xff]  ;;  %v151_v34 = vld [vmem:[#allocation7 + $0x2a0] sm:$0xff] }
  0x47   :  { %762 = vmatpush3.bf16.msra.mxu0 %v761_v10  ;;  %v134_v30 = vld [vmem:[#allocation7 + $0x218] sm:$0xff]  ;;  %v165_v31 = vld [vmem:[#allocation7 + $0x310] sm:$0xff]  ;;  %v831_v32 = vpack.c.bf16 %v182_v25, %v181_v23  ;;  %v152_v35 = vld [vmem:[#allocation7 + $0x2a8] sm:$0xff] }
  0x48   :  { %796 = vmatprep.subr.bf16.mxu0 %v795_v15  ;;  %v166_v33 = vld [vmem:[#allocation7 + $0x318] sm:$0xff]  ;;  %v183_v37 = vld [vmem:[#allocation7 + $0x3a0] sm:$0xff]  ;;  %v184_v39 = vld [vmem:[#allocation7 + $0x3a8] sm:$0xff]  ;;  %v801_v40 = vpack.c.bf16 %v134_v30, %v133_v29  ;;  %v803_v43 = vpack.c.bf16 %v152_v35, %v151_v34  ;;  %v957_v15 = vmov 0  }
  0x49   :  { %794 = vmatpush3.bf16.msra.mxu1 %v793_v14  ;;  %v833_v41 = vpack.c.bf16 %v166_v33, %v165_v31  ;;  %v135_v44 = vld [vmem:[#allocation7 + $0x220] sm:$0xff]  ;;  %v136_v46 = vld [vmem:[#allocation7 + $0x228] sm:$0xff]  ;;  %v835_v48 = vpack.c.bf16 %v184_v39, %v183_v37  ;;  %v153_v50 = vld [vmem:[#allocation7 + $0x2b0] sm:$0xff]  ;;  %868 = vset.pattern.permute.xlu1 %v957_v15 }
  0x4a   :  { %828 = vmatprep.subr.bf16.mxu1 %v827_v19  ;;  %260 = vmatmul.mubr.f32.vlgmr.msra.gmra.mrb[0].mxu0 %v1003_v38  ;;  %v167_v47 = vld [vmem:[#allocation7 + $0x320] sm:$0xff]  ;;  %v168_v49 = vld [vmem:[#allocation7 + $0x328] sm:$0xff]  ;;  %v154_v51 = vld [vmem:[#allocation7 + $0x2b8] sm:$0xff] }
  0x4b   :  { %798 = vmatpush3.bf16.msra.mxu0 %v797_v26  ;;  %264 = vmatprep.mubr.f32.mxu0 %v1013_v61  ;;  %v185_v38 = vld [vmem:[#allocation7 + $0x3b0] sm:$0xff]  ;;  %v186_v52 = vld [vmem:[#allocation7 + $0x3b8] sm:$0xff]  ;;  %v837_v53 = vpack.c.bf16 %v168_v49, %v167_v47  ;;  %v807_v54 = vpack.c.bf16 %v154_v51, %v153_v50  ;;  %v155_v59 = vld [vmem:[#allocation7 + $0x2c0] sm:$0xff] }
  0x4c   :  { %335 = vmatmul.mubr.f32.vlgmr.msra.gmra.mrb[0].mxu1 %v1005_v42  ;;  %800 = vmatprep.subr.bf16.mxu0 %v799_v28  ;;  %v805_v42 = vpack.c.bf16 %v136_v46, %v135_v44  ;;  %v137_v55 = vld [vmem:[#allocation7 + $0x230] sm:$0xff]  ;;  %v138_v56 = vld [vmem:[#allocation7 + $0x238] sm:$0xff]  ;;  %v839_v58 = vpack.c.bf16 %v186_v52, %v185_v38  ;;  %v156_v1 = vld [vmem:[#allocation7 + $0x2c8] sm:$0xff] }
  0x4d   :  { %830 = vmatpush3.bf16.msra.mxu1 %v829_v27  ;;  %339 = vmatprep.mubr.f32.mxu1 %v1024_v3  ;;  %v169_v57 = vld [vmem:[#allocation7 + $0x330] sm:$0xff]  ;;  %v170_v61 = vld [vmem:[#allocation7 + $0x338] sm:$0xff]  ;;  %v188_v3 = vld [vmem:[#allocation7 + $0x3c8] sm:$0xff]  ;;  %v811_v5 = vpack.c.bf16 %v156_v1, %v155_v59 }
  0x4e   :  { %832 = vmatprep.subr.bf16.mxu1 %v831_v32  ;;  %265 = vmatmul.mubr.f32.gmra.mrb[2].mxu0 %v1011_v60  ;;  %v187_v60 = vld [vmem:[#allocation7 + $0x3c0] sm:$0xff]  ;;  %v841_v2 = vpack.c.bf16 %v170_v61, %v169_v57  ;;  %v140_v8 = vld [vmem:[#allocation7 + $0x248] sm:$0xff]  ;;  %v157_v13 = vld [vmem:[#allocation7 + $0x2d0] sm:$0xff] }
  0x4f   :  { %802 = vmatpush3.bf16.msra.mxu0 %v801_v40  ;;  %409 = vmatprep.mubr.f32.mxu0 %v1017_v63  ;;  %v139_v7 = vld [vmem:[#allocation7 + $0x240] sm:$0xff]  ;;  %v843_v10 = vpack.c.bf16 %v188_v3, %v187_v60  ;;  %v172_v11 = vld [vmem:[#allocation7 + $0x348] sm:$0xff]  ;;  %v158_v14 = vld [vmem:[#allocation7 + $0x2d8] sm:$0xff] }
  0x50   :  { %340 = vmatmul.mubr.f32.gmra.mrb[2].mxu1 %v1015_v62  ;;  %804 = vmatprep.subr.bf16.mxu0 %v803_v43  ;;  %v809_v62 = vpack.c.bf16 %v138_v56, %v137_v55  ;;  %v171_v9 = vld [vmem:[#allocation7 + $0x340] sm:$0xff]  ;;  %v189_v63 = vld [vmem:[#allocation7 + $0x3d0] sm:$0xff]  ;;  %v190_v16 = vld [vmem:[#allocation7 + $0x3d8] sm:$0xff]  ;;  %v815_v18 = vpack.c.bf16 %v158_v14, %v157_v13 }
  0x51   :  { %834 = vmatpush3.bf16.msra.mxu1 %v833_v41  ;;  %484 = vmatprep.mubr.f32.mxu1 %v1028_v6  ;;  %v813_v6 = vpack.c.bf16 %v140_v8, %v139_v7  ;;  %v845_v17 = vpack.c.bf16 %v172_v11, %v171_v9  ;;  %v141_v19 = vld [vmem:[#allocation7 + $0x250] sm:$0xff]  ;;  %v142_v20 = vld [vmem:[#allocation7 + $0x258] sm:$0xff]  ;;  %v847_v22 = vpack.c.bf16 %v190_v16, %v189_v63  ;;  %v159_v25 = vld [vmem:[#allocation7 + $0x2e0] sm:$0xff] }
  0x52   :  { %836 = vmatprep.subr.bf16.mxu1 %v835_v48  ;;  %869 = vset.pattern.permute.xlu0 %v957_v15  ;;  %v173_v21 = vld [vmem:[#allocation7 + $0x350] sm:$0xff]  ;;  %v174_v23 = vld [vmem:[#allocation7 + $0x358] sm:$0xff]  ;;  %v160_v26 = vld [vmem:[#allocation7 + $0x2e8] sm:$0xff]  ;;  %v817_v29 = vpack.c.bf16 %v142_v20, %v141_v19 }
  0x53   :  { %806 = vmatpush3.bf16.msra.mxu0 %v805_v42  ;;  %v191_v27 = vld [vmem:[#allocation7 + $0x3e0] sm:$0xff]  ;;  %v192_v28 = vld [vmem:[#allocation7 + $0x3e8] sm:$0xff]  ;;  %v849_v30 = vpack.c.bf16 %v174_v23, %v173_v21  ;;  %v819_v31 = vpack.c.bf16 %v160_v26, %v159_v25  ;;  %v161_v39 = vld [vmem:[#allocation7 + $0x2f0] sm:$0xff] }
  0x54   :  { %808 = vmatprep.subr.bf16.mxu0 %v807_v54  ;;  %v143_v32 = vld [vmem:[#allocation7 + $0x260] sm:$0xff]  ;;  %v144_v33 = vld [vmem:[#allocation7 + $0x268] sm:$0xff]  ;;  %v851_v35 = vpack.c.bf16 %v192_v28, %v191_v27  ;;  %v162_v40 = vld [vmem:[#allocation7 + $0x2f8] sm:$0xff] }
  0x55   :  { %838 = vmatpush3.bf16.msra.mxu1 %v837_v53  ;;  %v175_v34 = vld [vmem:[#allocation7 + $0x360] sm:$0xff]  ;;  %v176_v37 = vld [vmem:[#allocation7 + $0x368] sm:$0xff]  ;;  %v193_v41 = vld [vmem:[#allocation7 + $0x3f0] sm:$0xff]  ;;  %v821_v44 = vpack.c.bf16 %v144_v33, %v143_v32  ;;  %v823_v47 = vpack.c.bf16 %v162_v40, %v161_v39 }
  0x56   :  { %840 = vmatprep.subr.bf16.mxu1 %v839_v58  ;;  %v194_v43 = vld [vmem:[#allocation7 + $0x3f8] sm:$0xff]  ;;  %v853_v46 = vpack.c.bf16 %v176_v37, %v175_v34  ;;  %v145_v48 = vld [vmem:[#allocation7 + $0x270] sm:$0xff] }
  0x57   :  { %810 = vmatpush3.bf16.msra.mxu0 %v809_v62  ;;  %v146_v49 = vld [vmem:[#allocation7 + $0x278] sm:$0xff]  ;;  %v855_v50 = vpack.c.bf16 %v194_v43, %v193_v41  ;;  %v177_v51 = vld [vmem:[#allocation7 + $0x370] sm:$0xff] }
  0x58   :  { %812 = vmatprep.subr.bf16.mxu0 %v811_v5  ;;  %v178_v38 = vld [vmem:[#allocation7 + $0x378] sm:$0xff]  ;;  %v825_v52 = vpack.c.bf16 %v146_v49, %v145_v48  ;;  %v499_v53 = vld [vmem:[#allocation3] sm:$0xff] }
  0x59   :  { %842 = vmatpush3.bf16.msra.mxu1 %v841_v2  ;;  %v857_v42 = vpack.c.bf16 %v178_v38, %v177_v51  ;;  %v500_v56 = vld [vmem:[#allocation3 + $0x8] sm:$0xff] }
  0x5a   :  { %844 = vmatprep.subr.bf16.mxu1 %v843_v10 }
  0x5b   :  { %814 = vmatpush3.bf16.msra.mxu0 %v813_v6 }
  0x5c   :  { %816 = vmatprep.subr.bf16.mxu0 %v815_v18 }
  0x5d   :  { %846 = vmatpush3.bf16.msra.mxu1 %v845_v17 }
  0x5e   :  { %848 = vmatprep.subr.bf16.mxu1 %v847_v22 }
  0x5f   :  { %818 = vmatpush3.bf16.msra.mxu0 %v817_v29 }
  0x60   :  { %820 = vmatprep.subr.bf16.mxu0 %v819_v31 }
  0x61   :  { %850 = vmatpush3.bf16.msra.mxu1 %v849_v30 }
  0x62   :  { %852 = vmatprep.subr.bf16.mxu1 %v851_v35 }
  0x63   :  { %822 = vmatpush3.bf16.msra.mxu0 %v821_v44 }
  0x64   :  { %824 = vmatprep.subr.bf16.mxu0 %v823_v47 }
  0x65   :  { %854 = vmatpush3.bf16.msra.mxu1 %v853_v46 }
  0x66   :  { %856 = vmatprep.subr.bf16.mxu1 %v855_v50 }
  0x67   :  { %826 = vmatpush3.bf16.msra.mxu0 %v825_v52 }
  0x69   :  { %858 = vmatpush3.bf16.msra.mxu1 %v857_v42 }
  0x6a   :  { %410 = vmatmul.mubr.f32.vlgmr.msra.gmra.mrb[4].mxu0 %v1008_v45 }
  0x6b   :  { %414 = vmatprep.mubr.f32.mxu0 %v1032_v12 }
  0x6c   :  { %485 = vmatmul.mubr.f32.vlgmr.msra.gmra.mrb[4].mxu1 %v1019_v0 }
  0x6d   :  { %489 = vmatprep.mubr.f32.mxu1 %v1040_v36 }
  0x6e   :  { %415 = vmatmul.mubr.f32.gmra.mrb[6].mxu0 %v1026_v4 }
  0x70   :  { %490 = vmatmul.mubr.f32.gmra.mrb[6].mxu1 %v1036_v24 }
  0xcd   :  { %v509_v54 = vpop.xlane.xlu0 %508 }
  0xce   :  { %v519_v55 = vadd.f32 %v509_v54, %v499_v53 }
  0xd0   :  { %522 = vst.msk [vmem:[#allocation3] sm:$0xff] %vm46_vm0, %v519_v55 }
  0xd1   :  { %v518_v57 = vpop.xlane.xlu0 %517 }
  0xd2   :  { %v520_v58 = vadd.f32 %v518_v57, %v500_v56 }
  0xd4   :  { %523 = vst.msk [vmem:[#allocation3 + $0x8] sm:$0xff] %vm46_vm0, %v520_v58 }
  0xd7   :  { %v529_v45 = vld [vmem:[#allocation3] sm:$0xff] }
  0xd8   :  { %870 = vrcp.f32 %v529_v45 }
  0xdb   :  { %v530_v0 = vld [vmem:[#allocation3 + $0x8] sm:$0xff] }
  0xdc   :  { %872 = vrcp.f32 %v530_v0 }
  0xe2   :  { %v871_v12 = vpop.eup %870 }
  0xe3   :  { %537 = vperm.xlu1 %868, %v871_v12  }
  0xe6   :  { %v873_v36 = vpop.eup %872 }
  0xe7   :  { %542 = vperm.xlu1 %868, %v873_v36  }
 0x11d   :  { %v611_v4 = vpop.f32.mrb[0].mxu0 }
 0x11e   :  { %v612_v61 = vpop.f32.mrb[1].mxu0 }
 0x11f   :  { %v649_v24 = vpop.f32.mrb[0].mxu1  ;;  %v613_v59 = vadd.f32 %v612_v61, %v611_v4 }
 0x120   :  { %v650_v1 = vpop.f32.mrb[1].mxu1 }
 0x121   :  { %v651_v60 = vadd.f32 %v650_v1, %v649_v24  ;;  %v614_v3 = vpop.f32.mrb[2].mxu0 }
 0x122   :  { %v615_v2 = vpop.f32.mrb[3].mxu0 }
 0x123   :  { %v337_v62 = vadd.f32 %v651_v60, %v613_v59  ;;  %v652_v5 = vpop.f32.mrb[2].mxu1  ;;  %v616_v7 = vadd.f32 %v615_v2, %v614_v3 }
 0x124   :  { %v653_v8 = vpop.f32.mrb[3].mxu1 }
 0x125   :  { %v654_v9 = vadd.f32 %v653_v8, %v652_v5 }
 0x127   :  { %v342_v10 = vadd.f32 %v654_v9, %v616_v7 }
 0x13d   :  { %v687_v11 = vpop.f32.mrb[4].mxu0 }
 0x13e   :  { %v688_v13 = vpop.f32.mrb[5].mxu0 }
 0x13f   :  { %v725_v14 = vpop.f32.mrb[4].mxu1  ;;  %v689_v15 = vadd.f32 %v688_v13, %v687_v11 }
 0x140   :  { %v726_v63 = vpop.f32.mrb[5].mxu1 }
 0x141   :  { %v727_v16 = vadd.f32 %v726_v63, %v725_v14  ;;  %v412_v6 = vadd.f32 %v689_v15, %v337_v62  ;;  %v690_v17 = vpop.f32.mrb[6].mxu0 }
 0x142   :  { %v691_v18 = vpop.f32.mrb[7].mxu0 }
 0x143   :  { %v728_v19 = vpop.f32.mrb[6].mxu1  ;;  %v692_v20 = vadd.f32 %v691_v18, %v690_v17  ;;  %v487_v22 = vadd.f32 %v727_v16, %v412_v6 }
 0x144   :  { %v729_v21 = vpop.f32.mrb[7].mxu1 }
 0x145   :  { %v730_v23 = vadd.f32 %v729_v21, %v728_v19  ;;  %v417_v25 = vadd.f32 %v692_v20, %v342_v10 }
 0x147   :  { %v492_v26 = vadd.f32 %v730_v23, %v417_v25 }
 0x162   :  { %v538_v27 = vpop.permute.xlu1 %537 }
 0x163   :  { %v545_v28 = vmul.f32 %v538_v27, %v487_v22 }
 0x165   :  { %v547_v29 = vmul.f32 %v545_v28, %v545_v28 }
 0x166   :  { %v543_v30 = vpop.permute.xlu1 %542 }
 0x167   :  { %549 = vadd.xlane.f32.xlu0 %v547_v29  ;;  %v546_v31 = vmul.f32 %v543_v30, %v492_v26 }
 0x169   :  { %v548_v32 = vmul.f32 %v546_v31, %v546_v31 }
 0x16b   :  { %551 = vadd.xlane.f32.xlu1 %v548_v32 }
 0x1f4   :  { %v550_v33 = vpop.xlane.xlu0 %549 }
 0x1f5   :  { %v553_v34 = vmax.f32 %v550_v33, 1e-24 }
 0x1f7   :  { %874 = vrsqrt.f32 %v553_v34 }
 0x1f8   :  { %v552_v35 = vpop.xlane.xlu1 %551 }
 0x1f9   :  { %v554_v37 = vmax.f32 %v552_v35, 1e-24 }
 0x1fb   :  { %876 = vrsqrt.f32 %v554_v37 }
 0x201   :  { %v875_v39 = vpop.eup %874 }
 0x202   :  { %v557_v40 = vmul.f32 %v875_v39, %v545_v28 }
 0x204   :  { %559 = vst [vmem:[#allocation9] sm:$0xff] %v557_v40 }
 0x205   :  { %v877_v41 = vpop.eup %876 }
 0x206   :  { %v558_v43 = vmul.f32 %v877_v41, %v546_v31 }
 0x208   :  { %560 = vst [vmem:[#allocation9 + $0x8] sm:$0xff] %v558_v43 }
 0x209   :  { %933 = shalt.err (!%p930_p6)
}
 0x20a   :  { %s934_s12 = scalar_lea.hbm %s1078_s2, 256 }
 0x20b   :  { %p935_p7 = scmp.ne.s32.totalorder %s1078_s2, %s934_s12  ;;  %p938_p8 = scmp.lt.u32.totalorder %s934_s12, %s1078_s2 }
 0x20d   :  { %p940_p9 = pnand %p938_p8, %p935_p7 }
 0x20f   :  { %943 = shalt.err (!%p940_p9)
}
 0x210   :  { %572 = dma.vmem_to_hbm [thread:$0]  %s567_s8, 256, %s1078_s2, [#allocation6], %s954_s0, %s954_s0, %s955_s5  }
 0x211   :  { %948 = dma.done.wait [#allocation6], 256  }
 0x212   :  { %949 = vsyncadd [#allocation6], 4294967040 }
 0x213   :  { %576 = vsyncpa [#allocation5], 1 }
 0x214   :  { %577 = vsyncpa [#allocation8], 1 }
 0x215   :  { %578 = vsyncpa [#allocation6], 1 }

</bundles_post_ra>
